<compile_context>
chip_gen: v6e
topology: v6e:2x2x1
jax: 0.10.0
libtpu: 0.0.40
codegen_flags: <defaults>
</compile_context>

<pallas_src>
import functools
import math

import jax
import jax.numpy as jnp
from jax import lax
from jax.experimental import pallas as pl
from jax.experimental.pallas import tpu as pltpu


# ------------------------------------------------------------------
# Per-generation configuration (v5e/v6e: 128 MiB VMEM, v7x: 64 MiB).
# ------------------------------------------------------------------
def _vmem_capacity_bytes():
    """Physical VMEM per core; drives tile sizes and the scoped-VMEM cap."""
    try:
        info = pltpu.get_tpu_info()
        for attr in ("vmem_capacity_bytes", "vmem_size_bytes", "vmem_bytes"):
            v = getattr(info, attr, None)
            if v:
                return int(v)
    except Exception:
        pass
    return 64 * 1024 * 1024                      # conservative (v7x-sized) fallback


_VMEM_CAP = _vmem_capacity_bytes()
_BIG_VMEM = _VMEM_CAP >= 100 * 1024 * 1024       # True on v5e/v6e (128 MiB), False on v7x
# v7x: keep >= 20 MiB headroom under 64 MiB physical for Mosaic internal scratch and
# double buffers; v5e/v6e can afford the bigger tiles below.
_VMEM_LIMIT = (96 if _BIG_VMEM else 40) * 1024 * 1024


def _pick_tile(dim, candidates):
    """Largest candidate dividing `dim`, else smaller powers of two, else full dim."""
    for c in candidates:
        if dim >= c and dim % c == 0:
            return c
    c = min(candidates)
    while c >= 8:
        if dim % c == 0:
            return c
        c //= 2
    # TODO(synk): pad ragged dims to a tile multiple (with kv-tail masking) instead of
    # one full-dim block, which can blow the VMEM budget for huge non-divisible dims.
    return dim


def _head_group_width(E, D):
    """Lane width of one attention head group (kept 128-aligned whenever possible)."""
    if D % 128 == 0:
        return D                       # one head per group, already lane-aligned
    if 128 % D == 0 and E % 128 == 0:
        return 128                     # pack 128//D heads per 128-lane group
    return E                           # tiny / odd embeddings: single full-width group


# ------------------------------------------------------------------
# Kernel 1: fused Q/K/V projection (ONE pallas_call).
#   y = x @ W^T + b for x in {xq, xk, xv}.  The three LHS tiles are concatenated
#   into one (3*tm, tk) operand so the (tk, tn) weight tile is fed to the MXU ONCE
#   per grid step (W stationary) instead of 3x.  The softmax scale is folded into
#   Q here so attention never scales the (tq, tkv) score matrix.  Matmul operands
#   are the compute dtype (bf16 in production); the accumulator stays f32 in VMEM.
# ------------------------------------------------------------------
def _qkv_proj_kernel(xq_ref, xk_ref, xv_ref, w_ref, b_ref,
                     q_ref, k_ref, v_ref, acc_ref, *, scale):
    kk = pl.program_id(3)
    tm = xq_ref.shape[1]

    @pl.when(kk == 0)
    def _():
        acc_ref[...] = jnp.zeros(acc_ref.shape, acc_ref.dtype)

    # Keep W stationary across Q/K/V: one (3*tm, tk) LHS -> single MXU pass.
    x_cat = jnp.concatenate([xq_ref[0], xk_ref[0], xv_ref[0]], axis=0)
    acc_ref[...] += jnp.dot(x_cat, w_ref[...], preferred_element_type=jnp.float32)

    @pl.when(kk == pl.num_programs(3) - 1)
    def _():
        bias = b_ref[...]                                        # (1, tn) f32
        q_ref[0] = ((acc_ref[0:tm] + bias) * scale).astype(q_ref.dtype)  # scale folded into Q
        k_ref[0] = (acc_ref[tm:2 * tm] + bias).astype(k_ref.dtype)
        v_ref[0] = (acc_ref[2 * tm:3 * tm] + bias).astype(v_ref.dtype)


def qkv_projection(xq, xk, xv, w_t, b, scale, compute_dtype):
    """xq/xk/xv: (B,S,E); w_t: (E,E)=W^T; b: (E,) -> Q*scale, K, V all (B,S,E)."""
    B, S, E = xq.shape
    tm = _pick_tile(S, (512, 256, 128))                       # weight-stream reuse ~ tm
    tn = _pick_tile(E, (1024, 512, 256, 128) if _BIG_VMEM else (512, 256, 128))
    tk = _pick_tile(E, (512, 256, 128))
    grid = (B, S // tm, E // tn, E // tk)

    # bf16 matmul operands in production; f32 only for tight numerics/debug.
    xq = xq.astype(compute_dtype)
    xk = xk.astype(compute_dtype)
    xv = xv.astype(compute_dtype)
    w_t = w_t.astype(compute_dtype)

    x_spec = pl.BlockSpec((1, tm, tk), lambda b_, i, j, k: (b_, i, k))
    out_spec = pl.BlockSpec((1, tm, tn), lambda b_, i, j, k: (b_, i, j))
    out_sd = jax.ShapeDtypeStruct((B, S, E), compute_dtype)

    return pl.pallas_call(
        functools.partial(_qkv_proj_kernel, scale=scale),
        out_shape=(out_sd, out_sd, out_sd),
        grid_spec=pltpu.PrefetchScalarGridSpec(
            num_scalar_prefetch=0,
            grid=grid,
            in_specs=[
                x_spec, x_spec, x_spec,
                pl.BlockSpec((tk, tn), lambda b_, i, j, k: (k, j)),
                pl.BlockSpec((1, tn), lambda b_, i, j, k: (0, j)),
            ],
            out_specs=[out_spec, out_spec, out_spec],
            scratch_shapes=[pltpu.VMEM((3 * tm, tn), jnp.float32)],
        ),
        compiler_params=pltpu.CompilerParams(
            dimension_semantics=("parallel", "parallel", "parallel", "arbitrary"),
            vmem_limit_bytes=_VMEM_LIMIT),
    )(xq, xk, xv, w_t, b.reshape(1, E).astype(jnp.float32))


# ------------------------------------------------------------------
# Kernel 2: flash-style attention directly in (B, S, E) layout.
#   Grid (B, q-tiles, head-groups, kv-tiles); kv axis last and 'arbitrary'.
#   Each grid step reads lane-dense (tq, G)/(tkv, G) slabs (G = 128-aligned head
#   group), so the in-kernel head loop is bounded by 128//D (<=2 for real models),
#   and the persistent softmax stats are per-(head,row) scalars (hpg, tq, 1)
#   instead of (tq, E).  Optional attn_mask applies masked_fill(mask==1, -inf)
#   like the PyTorch module.
# ------------------------------------------------------------------
def _mha_flash_kernel(*refs, heads_per_group, head_dim, has_mask):
    if has_mask:
        q_ref, k_ref, v_ref, mask_ref, o_ref, m_sc, l_sc, acc_sc = refs
    else:
        q_ref, k_ref, v_ref, o_ref, m_sc, l_sc, acc_sc = refs
        mask_ref = None

    j = pl.program_id(3)

    @pl.when(j == 0)
    def _():
        m_sc[...] = jnp.full(m_sc.shape, -jnp.inf, m_sc.dtype)
        l_sc[...] = jnp.zeros(l_sc.shape, l_sc.dtype)
        acc_sc[...] = jnp.zeros(acc_sc.shape, acc_sc.dtype)

    q = q_ref[0]                                   # (tq, G)  -- Q is pre-scaled
    k = k_ref[0]                                   # (tkv, G)
    v = v_ref[0]                                   # (tkv, G)

    neg_inf = float("-inf")
    if has_mask:
        masked = mask_ref[0] == 1                  # (tq, tkv) bool, 1 => -inf (PyTorch semantics)

    D = head_dim
    # Heads inside one 128-lane group: <= 2 for real models (D >= 64), so the static
    # unroll stays tiny; the head-group GRID axis handles the rest.
    for h in range(heads_per_group):
        sl = slice(h * D, (h + 1) * D)
        # Q @ K^T without materialising the transpose (contract last dims).
        s = lax.dot_general(q[:, sl], k[:, sl], (((1,), (1,)), ((), ())),
                            preferred_element_type=jnp.float32)          # (tq, tkv) f32
        if has_mask:
            s = jnp.where(masked, neg_inf, s)

        m_prev = m_sc[h]                                                 # (tq, 1)
        m_new = jnp.maximum(m_prev, jnp.max(s, axis=-1, keepdims=True))
        # Guard fully-masked rows: exp(-inf - -inf) would be NaN mid-stream.
        m_exp = jnp.where(m_new > neg_inf, m_new, 0.0)
        alpha = jnp.exp(m_prev - m_exp)                                  # (tq, 1)
        p = jnp.exp(s - m_exp)                                           # (tq, tkv) f32
        l_sc[h] = alpha * l_sc[h] + jnp.sum(p, axis=-1, keepdims=True)
        acc_sc[:, sl] = alpha * acc_sc[:, sl] + jnp.dot(
            p.astype(v.dtype), v[:, sl], preferred_element_type=jnp.float32)
        m_sc[h] = m_new

    @pl.when(j == pl.num_programs(3) - 1)
    def _():
        # Exact division (off the hot loop) -> tight numerics vs the reference.
        parts = [acc_sc[:, h * D:(h + 1) * D] / l_sc[h] for h in range(heads_per_group)]
        o_ref[0] = jnp.concatenate(parts, axis=-1).astype(o_ref.dtype)   # lane-dense store


def mha_attention(q, k, v, num_heads, out_dtype, attn_mask=None):
    """q/k/v: (B,S,E) with heads as contiguous D-slices of the last dim -> (B,S,E)."""
    B, S, E = q.shape
    D = E // num_heads
    G = _head_group_width(E, D)
    heads_per_group = G // D
    n_groups = E // G

    # v5e/v6e: KV stream is bandwidth-bound at tq=256 -> use 512 for 2x K/V reuse.
    # v7x (64 MiB VMEM, 3.2 TB/s HBM): tq=256 is already near compute-bound.
    tq = _pick_tile(S, (512, 256, 128) if _BIG_VMEM else (256, 128))
    tkv = _pick_tile(S, (256, 128))
    # NOTE(megacore/v7x): B and S//tq are 'parallel' axes; with B==1 keep S//tq even
    # so both TensorCores stay busy.
    grid = (B, S // tq, n_groups, S // tkv)

    q_spec = pl.BlockSpec((1, tq, G), lambda b_, i, g, j: (b_, i, g))
    kv_spec = pl.BlockSpec((1, tkv, G), lambda b_, i, g, j: (b_, j, g))
    o_spec = pl.BlockSpec((1, tq, G), lambda b_, i, g, j: (b_, i, g))
    # TODO(synk): on v5e, pipeline_mode=pl.Buffered(3) on kv_spec if profiling shows
    # exposed K/V DMA latency (128 MiB VMEM has room); not needed on v6e/v7x.

    in_specs = [q_spec, kv_spec, kv_spec]
    inputs = [q, k, v]
    has_mask = attn_mask is not None
    if has_mask:
        mask = jnp.asarray(attn_mask)
        if mask.ndim == 2:
            mask = mask[None]                       # (1, S, S)
        mask = mask.astype(jnp.int32)
        if mask.shape[0] == 1:
            mask_map = lambda b_, i, g, j: (0, i, j)
        else:
            mask_map = lambda b_, i, g, j: (b_, i, j)
        # TODO(synk): per-head (B, H, S, S) masks not supported; only (S,S)/(B,S,S).
        in_specs.append(pl.BlockSpec((1, tq, tkv), mask_map))
        inputs.append(mask)

    return pl.pallas_call(
        functools.partial(_mha_flash_kernel, heads_per_group=heads_per_group,
                          head_dim=D, has_mask=has_mask),
        out_shape=jax.ShapeDtypeStruct((B, S, E), out_dtype),
        grid_spec=pltpu.PrefetchScalarGridSpec(
            num_scalar_prefetch=0,
            grid=grid,
            in_specs=in_specs,
            out_specs=o_spec,
            scratch_shapes=[
                pltpu.VMEM((heads_per_group, tq, 1), jnp.float32),   # running max (per head)
                pltpu.VMEM((heads_per_group, tq, 1), jnp.float32),   # running denom (per head)
                pltpu.VMEM((tq, G), jnp.float32),                    # output accumulator
            ],
        ),
        compiler_params=pltpu.CompilerParams(
            dimension_semantics=("parallel", "parallel", "parallel", "arbitrary"),
            vmem_limit_bytes=_VMEM_LIMIT),
    )(*inputs)


# ------------------------------------------------------------------
# Module wrapper (mirrors MutilHeadAttention.forward exactly, incl. the original's
# use of linearQ for Q, K and V, and scale = embed_dim**-0.5).
# ------------------------------------------------------------------
class MutilHeadAttentionPallas:
    def __init__(self, embed_dim, num_heads, key, compute_dtype=jnp.bfloat16):
        assert embed_dim % num_heads == 0
        self.embed_dim = embed_dim
        self.num_heads = num_heads
        self.head_dim = embed_dim // num_heads
        self.scale = embed_dim ** (-0.5)
        # Production default is bf16 matmul operands (MXU-native on all generations,
        # halves HBM/VMEM traffic); softmax math and all accumulation remain f32.
        self.compute_dtype = compute_dtype
        kw, kb = jax.random.split(key)
        bound = 1.0 / math.sqrt(embed_dim)
        # nn.Linear weight is (out, in); store transposed for x @ W^T
        self.wq_t = jax.random.uniform(kw, (embed_dim, embed_dim),
                                       jnp.float32, -bound, bound)
        self.bq = jax.random.uniform(kb, (embed_dim,), jnp.float32, -bound, bound)

    def __call__(self, xq, xk, xv, attn_mask=None, compute_dtype=None):
        # NOTE: original module applies linearQ to all three inputs; mirrored here
        # intentionally (do not "fix" to separate K/V weights).
        cd = compute_dtype if compute_dtype is not None else self.compute_dtype
        Q, K, V = qkv_projection(xq, xk, xv, self.wq_t, self.bq, self.scale, cd)
        return mha_attention(Q, K, V, self.num_heads, xq.dtype, attn_mask=attn_mask)


# ------------------------------------------------------------------
# Pure-JAX reference (highest precision) for correctness checks.
# ------------------------------------------------------------------
def _reference(xq, xk, xv, w_t, b, num_heads, scale, attn_mask=None):
    B, S, E = xq.shape
    H = num_heads
    D = E // H
    hp = jax.lax.Precision.HIGHEST

    def proj(x):
        return (jnp.dot(x, w_t, precision=hp) + b).reshape(B, S, H, D).transpose(0, 2, 1, 3)

    q, k, v = proj(xq), proj(xk), proj(xv)
    s = jnp.einsum("bhqd,bhkd->bhqk", q, k, precision=hp) * scale
    if attn_mask is not None:
        s = jnp.where(attn_mask == 1, -jnp.inf, s)
    p = jax.nn.softmax(s, axis=-1)
    o = jnp.einsum("bhqk,bhkd->bhqd", p, v, precision=hp)
    return o.transpose(0, 2, 1, 3).reshape(B, S, E)


if __name__ == "__main__":
    B, S, E, H = 2, 8, 32, 4
    key = jax.random.PRNGKey(0)
    kq, kk, kv, kp = jax.random.split(key, 4)
    xq = jax.random.normal(kq, (B, S, E), jnp.float32)
    xk = jax.random.normal(kk, (B, S, E), jnp.float32)
    xv = jax.random.normal(kv, (B, S, E), jnp.float32)

    mha = MutilHeadAttentionPallas(E, H, kp)            # bf16 production default
    ref = _reference(xq, xk, xv, mha.wq_t, mha.bq, H, mha.scale)

    # 1) f32 compute path: tight numerical check (exact finalize division, no approx).
    out_f32 = jax.block_until_ready(mha(xq, xk, xv, compute_dtype=jnp.float32))
    assert out_f32.shape == (B, S, E)
    assert jnp.allclose(out_f32, ref, atol=5e-3, rtol=5e-3), "f32 path mismatch vs reference"

    # 2) masked path (mask == 1 => -inf, PyTorch masked_fill semantics), f32 compute.
    causal = (jnp.arange(S)[None, :] > jnp.arange(S)[:, None]).astype(jnp.int32)
    out_msk = jax.block_until_ready(
        mha(xq, xk, xv, attn_mask=causal, compute_dtype=jnp.float32))
    ref_msk = _reference(xq, xk, xv, mha.wq_t, mha.bq, H, mha.scale, attn_mask=causal)
    assert jnp.allclose(out_msk, ref_msk, atol=5e-3, rtol=5e-3), "masked path mismatch"

    # 3) bf16 production path: looser tolerance (bf16 matmul operands, f32 accumulation).
    out_bf16 = jax.block_until_ready(mha(xq, xk, xv))
    assert jnp.allclose(out_bf16, ref, atol=1e-1, rtol=1e-1), "bf16 path mismatch"

    print("KERNEL_OK")
</pallas_src>

<mosaic_0001>
module attributes {stable_mosaic.version = 11 : i64} {
  func.func @_qkv_proj_kernel(%arg0: i32, %arg1: i32, %arg2: i32, %arg3: i32, %arg4: memref<1x8x32xf32, #tpu.memory_space<vmem>>, %arg5: memref<1x8x32xf32, #tpu.memory_space<vmem>>, %arg6: memref<1x8x32xf32, #tpu.memory_space<vmem>>, %arg7: memref<32x32xf32, #tpu.memory_space<vmem>>, %arg8: memref<1x32xf32, #tpu.memory_space<vmem>>, %arg9: memref<1x8x32xf32, #tpu.memory_space<vmem>>, %arg10: memref<1x8x32xf32, #tpu.memory_space<vmem>>, %arg11: memref<1x8x32xf32, #tpu.memory_space<vmem>>, %arg12: memref<24x32xf32, #tpu.memory_space<vmem>>) attributes {dimension_semantics = [#tpu.dimension_semantics<parallel>, #tpu.dimension_semantics<parallel>, #tpu.dimension_semantics<parallel>, #tpu.dimension_semantics<arbitrary>], iteration_bounds = array<i64: 2, 1, 1, 1>, scalar_prefetch = 0 : i64, scratch_operands = 1 : i64, tpu.core_type = #tpu.core_type<tc>, window_params = [{transform_indices = @transform_0, window_bounds = array<i64: 1, 8, 32>}, {transform_indices = @transform_1, window_bounds = array<i64: 1, 8, 32>}, {transform_indices = @transform_2, window_bounds = array<i64: 1, 8, 32>}, {transform_indices = @transform_3, window_bounds = array<i64: 32, 32>}, {transform_indices = @transform_4, window_bounds = array<i64: 1, 32>}, {transform_indices = @transform_5, window_bounds = array<i64: 1, 8, 32>}, {transform_indices = @transform_6, window_bounds = array<i64: 1, 8, 32>}, {transform_indices = @transform_7, window_bounds = array<i64: 1, 8, 32>}]} {
    %c0_i32 = arith.constant 0 : i32
    %0 = arith.cmpi eq, %arg3, %c0_i32 : i32
    %1 = arith.extui %0 : i1 to i32
    %c0_i32_0 = arith.constant 0 : i32
    %2 = arith.cmpi ne, %1, %c0_i32_0 : i32
    scf.if %2 {
      %cst_17 = arith.constant 0.000000e+00 : f32
      %18 = vector.broadcast %cst_17 : f32 to vector<24x32xf32>
      %c0_18 = arith.constant 0 : index
      %c0_19 = arith.constant 0 : index
      %19 = vector.load %arg12[%c0_18, %c0_19] : memref<24x32xf32, #tpu.memory_space<vmem>>, vector<24x32xf32>
      tpu.vector_store %arg12[%c0_18, %c0_19], %18 {strides = array<i32>} : memref<24x32xf32, #tpu.memory_space<vmem>>, vector<24x32xf32>,
    } else {
    }
    %c0 = arith.constant 0 : index
    %c0_1 = arith.constant 0 : index
    %c0_2 = arith.constant 0 : index
    %3 = vector.load %arg4[%c0, %c0_1, %c0_2] : memref<1x8x32xf32, #tpu.memory_space<vmem>>, vector<1x8x32xf32>
    %4 = vector.shape_cast %3 : vector<1x8x32xf32> to vector<8x32xf32>
    %c0_3 = arith.constant 0 : index
    %c0_4 = arith.constant 0 : index
    %c0_5 = arith.constant 0 : index
    %5 = vector.load %arg5[%c0_3, %c0_4, %c0_5] : memref<1x8x32xf32, #tpu.memory_space<vmem>>, vector<1x8x32xf32>
    %6 = vector.shape_cast %5 : vector<1x8x32xf32> to vector<8x32xf32>
    %c0_6 = arith.constant 0 : index
    %c0_7 = arith.constant 0 : index
    %c0_8 = arith.constant 0 : index
    %7 = vector.load %arg6[%c0_6, %c0_7, %c0_8] : memref<1x8x32xf32, #tpu.memory_space<vmem>>, vector<1x8x32xf32>
    %8 = vector.shape_cast %7 : vector<1x8x32xf32> to vector<8x32xf32>
    %9 = tpu.concatenate %4, %6, %8 in 0 : vector<8x32xf32>, vector<8x32xf32>, vector<8x32xf32> -> vector<24x32xf32>
    %c0_9 = arith.constant 0 : index
    %c0_10 = arith.constant 0 : index
    %10 = vector.load %arg12[%c0_9, %c0_10] : memref<24x32xf32, #tpu.memory_space<vmem>>, vector<24x32xf32>
    %c0_11 = arith.constant 0 : index
    %c0_12 = arith.constant 0 : index
    %11 = vector.load %arg7[%c0_11, %c0_12] : memref<32x32xf32, #tpu.memory_space<vmem>>, vector<32x32xf32>
    %cst = arith.constant dense<0.000000e+00> : vector<24x32xf32>
    %12 = tpu.matmul %9, %11, %cst {dimension_numbers = #tpu.dot_dimension_numbers<[1], [0], [0], [1], [0, 0, 1, 1], [], []>} : vector<24x32xf32>, vector<32x32xf32>, vector<24x32xf32> -> vector<24x32xf32>
    %13 = arith.addf %10, %12 : vector<24x32xf32>
    %c0_13 = arith.constant 0 : index
    %c0_14 = arith.constant 0 : index
    %14 = vector.load %arg12[%c0_13, %c0_14] : memref<24x32xf32, #tpu.memory_space<vmem>>, vector<24x32xf32>
    tpu.vector_store %arg12[%c0_13, %c0_14], %13 {strides = array<i32>} : memref<24x32xf32, #tpu.memory_space<vmem>>, vector<24x32xf32>,
    %c0_i32_15 = arith.constant 0 : i32
    %15 = arith.cmpi eq, %arg3, %c0_i32_15 : i32
    %16 = arith.extui %15 : i1 to i32
    %c0_i32_16 = arith.constant 0 : i32
    %17 = arith.cmpi ne, %16, %c0_i32_16 : i32
    scf.if %17 {
      %c0_17 = arith.constant 0 : index
      %c0_18 = arith.constant 0 : index
      %18 = vector.load %arg8[%c0_17, %c0_18] : memref<1x32xf32, #tpu.memory_space<vmem>>, vector<1x32xf32>
      %c0_19 = arith.constant 0 : index
      %c0_20 = arith.constant 0 : index
      %19 = vector.load %arg12[%c0_19, %c0_20] : memref<24x32xf32, #tpu.memory_space<vmem>>, vector<8x32xf32>
      %20 = vector.broadcast %18 : vector<1x32xf32> to vector<8x32xf32>
      %21 = arith.addf %19, %20 : vector<8x32xf32>
      %cst_21 = arith.constant 0.176776692 : f32
      %22 = vector.broadcast %cst_21 : f32 to vector<8x32xf32>
      %23 = arith.mulf %21, %22 : vector<8x32xf32>
      %c0_22 = arith.constant 0 : index
      %c0_23 = arith.constant 0 : index
      %c0_24 = arith.constant 0 : index
      %24 = vector.load %arg9[%c0_22, %c0_23, %c0_24] : memref<1x8x32xf32, #tpu.memory_space<vmem>>, vector<1x8x32xf32>
      %25 = vector.shape_cast %24 : vector<1x8x32xf32> to vector<8x32xf32>
      %26 = vector.shape_cast %23 : vector<8x32xf32> to vector<1x8x32xf32>
      tpu.vector_store %arg9[%c0_22, %c0_23, %c0_24], %26 {strides = array<i32>} : memref<1x8x32xf32, #tpu.memory_space<vmem>>, vector<1x8x32xf32>,
      %c8 = arith.constant 8 : index
      %c0_25 = arith.constant 0 : index
      %27 = vector.load %arg12[%c8, %c0_25] : memref<24x32xf32, #tpu.memory_space<vmem>>, vector<8x32xf32>
      %28 = vector.broadcast %18 : vector<1x32xf32> to vector<8x32xf32>
      %29 = arith.addf %27, %28 : vector<8x32xf32>
      %c0_26 = arith.constant 0 : index
      %c0_27 = arith.constant 0 : index
      %c0_28 = arith.constant 0 : index
      %30 = vector.load %arg10[%c0_26, %c0_27, %c0_28] : memref<1x8x32xf32, #tpu.memory_space<vmem>>, vector<1x8x32xf32>
      %31 = vector.shape_cast %30 : vector<1x8x32xf32> to vector<8x32xf32>
      %32 = vector.shape_cast %29 : vector<8x32xf32> to vector<1x8x32xf32>
      tpu.vector_store %arg10[%c0_26, %c0_27, %c0_28], %32 {strides = array<i32>} : memref<1x8x32xf32, #tpu.memory_space<vmem>>, vector<1x8x32xf32>,
      %c16 = arith.constant 16 : index
      %c0_29 = arith.constant 0 : index
      %33 = vector.load %arg12[%c16, %c0_29] : memref<24x32xf32, #tpu.memory_space<vmem>>, vector<8x32xf32>
      %34 = vector.broadcast %18 : vector<1x32xf32> to vector<8x32xf32>
      %35 = arith.addf %33, %34 : vector<8x32xf32>
      %c0_30 = arith.constant 0 : index
      %c0_31 = arith.constant 0 : index
      %c0_32 = arith.constant 0 : index
      %36 = vector.load %arg11[%c0_30, %c0_31, %c0_32] : memref<1x8x32xf32, #tpu.memory_space<vmem>>, vector<1x8x32xf32>
      %37 = vector.shape_cast %36 : vector<1x8x32xf32> to vector<8x32xf32>
      %38 = vector.shape_cast %35 : vector<8x32xf32> to vector<1x8x32xf32>
      tpu.vector_store %arg11[%c0_30, %c0_31, %c0_32], %38 {strides = array<i32>} : memref<1x8x32xf32, #tpu.memory_space<vmem>>, vector<1x8x32xf32>,
    } else {
    }
    return
  }
  func.func @transform_0(%arg0: i32, %arg1: i32, %arg2: i32, %arg3: i32) -> (i32, i32, i32) {
    %c0_i32 = arith.constant 0 : i32
    return %arg0, %arg1, %arg3 : i32, i32, i32
  }
  func.func @transform_1(%arg0: i32, %arg1: i32, %arg2: i32, %arg3: i32) -> (i32, i32, i32) {
    %c0_i32 = arith.constant 0 : i32
    return %arg0, %arg1, %arg3 : i32, i32, i32
  }
  func.func @transform_2(%arg0: i32, %arg1: i32, %arg2: i32, %arg3: i32) -> (i32, i32, i32) {
    %c0_i32 = arith.constant 0 : i32
    return %arg0, %arg1, %arg3 : i32, i32, i32
  }
  func.func @transform_3(%arg0: i32, %arg1: i32, %arg2: i32, %arg3: i32) -> (i32, i32) {
    %c0_i32 = arith.constant 0 : i32
    return %arg3, %arg2 : i32, i32
  }
  func.func @transform_4(%arg0: i32, %arg1: i32, %arg2: i32, %arg3: i32) -> (i32, i32) {
    %c0_i32 = arith.constant 0 : i32
    %c0_i32_0 = arith.constant 0 : i32
    return %c0_i32, %arg2 : i32, i32
  }
  func.func @transform_5(%arg0: i32, %arg1: i32, %arg2: i32, %arg3: i32) -> (i32, i32, i32) {
    %c0_i32 = arith.constant 0 : i32
    return %arg0, %arg1, %arg2 : i32, i32, i32
  }
  func.func @transform_6(%arg0: i32, %arg1: i32, %arg2: i32, %arg3: i32) -> (i32, i32, i32) {
    %c0_i32 = arith.constant 0 : i32
    return %arg0, %arg1, %arg2 : i32, i32, i32
  }
  func.func @transform_7(%arg0: i32, %arg1: i32, %arg2: i32, %arg3: i32) -> (i32, i32, i32) {
    %c0_i32 = arith.constant 0 : i32
    return %arg0, %arg1, %arg2 : i32, i32, i32
  }
}

</mosaic_0001>

<bundles_post_ra>
// kernel: tpu_custom_call.1
= control target key start
LH: loop header
LB: loop body
LE: loop exit
PB: predicated region body
PF: predicated region fallthrough
CT: control target
= control target key end

     0   :  { %s1705_s0 = inlined_call_operand.hbm [shape: f32[2,8,32], index: 0, kind: input, shape index: {}]   ;;  %s1706_s1 = inlined_call_operand.hbm [shape: f32[2,8,32], index: 1, kind: input, shape index: {}]   ;;  %s1707_s2 = inlined_call_operand.hbm [shape: f32[2,8,32], index: 2, kind: input, shape index: {}]   ;;  %s1708_s3 = inlined_call_operand.hbm [shape: f32[32,32], index: 3, kind: input, shape index: {}]   ;;  %s1709_s4 = inlined_call_operand.vmem [shape: f32[1,32], index: 4, kind: input, shape index: {}]   ;;  %s1710_s5 = inlined_call_operand.hbm [shape: f32[2,8,32], index: 5, kind: output, shape index: {0}]   ;;  %s1711_s6 = inlined_call_operand.hbm [shape: f32[2,8,32], index: 6, kind: output, shape index: {1}]   ;;  %s1712_s7 = inlined_call_operand.hbm [shape: f32[2,8,32], index: 7, kind: output, shape index: {2}]  }
   0x1   :  { %1723 = sst [smem:[#allocation26_spill]] %s1706_s1 }
   0x2   :  { %13 = vsyncpa [#allocation4], 0 }
   0x3   :  { %15 = vsyncpa [#allocation4 + $0x1], 0 }
   0x4   :  { %16 = vsyncpa [#allocation7], 0 }
   0x5   :  { %18 = vsyncpa [#allocation7 + $0x1], 0 }
   0x6   :  { %19 = vsyncpa [#allocation10], 0 }
   0x7   :  { %20 = vsyncpa [#allocation5], 0 }
   0x8   :  { %22 = vsyncpa [#allocation5 + $0x1], 0 }
   0x9   :  { %23 = vsyncpa [#allocation13], 0 }
   0xa   :  { %25 = vsyncpa [#allocation13 + $0x1], 0  ;;  %s1364_s24 = smov 0   ;;  %s1366_s25 = smov 0  }
   0xb   :  { %s1368_s26 = smov 0   ;;  %s1370_s27 = smov 0  }
   0xc   :  { %s1372_s28 = smov 0   ;;  %s1374_s29 = smov 0  }
   0xd LB: > { %1724 = sst [smem:[#allocation20_spill]] %s1291_s24  ;;  %s57_s30 = sadd.s32 1, %s1307_s28  ;;  %s1311_s29 = sphi %s1374_s29, %s31_s29   ;;  %s1307_s28 = sphi %s1372_s28, %s1754_s28   ;;  %s1303_s27 = sphi %s1370_s27, %s1749_s27   ;;  %s1299_s26 = sphi %s1368_s26, %s1753_s26   ;;  %s1295_s25 = sphi %s1366_s25, %s1752_s25   ;;  %s1291_s24 = sphi %s1364_s24, %s1751_s24  }
   0xe   : > { %1725 = sst [smem:[#allocation21_spill]] %s1307_s28  ;;  %s68_s8 = sadd.s32 1, %s1299_s26 }
   0xf   : > { %1726 = sst [smem:[#allocation22_spill]] %s1311_s29  ;;  %p59_p0 = scmp.ge.s32.totalorder %s57_s30, 2 }
  0x10   : > { %p75_p1 = scmp.ne.s32.totalorder %s1299_s26, %s1295_s25  ;;  %p76_p2 = scmp.eq.s32.totalorder %s1311_s29, 0 }
  0x11   : > { %s1756_s30 = smov (%p59_p0, %s57_s30), 0  ;;  %p1001_p5 = scmp.lt.s32.totalorder %s1311_s29, 2 }
  0x12   : > { %1727 = sst [smem:[#allocation23_spill]] %s1756_s30  ;;  %p77_p4 = por %p76_p2, %p75_p1 }
  0x13   : > { %s61_s9 = ssub.s32 %s1307_s28, %s1756_s30  ;;  %s1714_s10 = sand.u32 1, %s1299_s26  }
  0x14   : > { %p66_p6 = scmp.eq.s32.totalorder %s61_s9, 0  ;;  %s1411_s11 = sshll.u32 %s1714_s10, 3 }
  0x15   : > { %s1414_s12 = sshll.u32 %s1307_s28, 7  ;;  %p1416_p7 = pnand %p1001_p5, %p77_p4 }
  0x16   : > { %s1421_s14 = scalar_select %p66_p6, %s1299_s26, %s68_s8  }
  0x17   : > { %s352_s15 = sand.u32 1, %s1311_s29   ;;  %s1730_s1 = sld [smem:[#allocation26_spill]] }
  0x18   : > { %1729 = sst [smem:[#allocation24_spill]] %s1421_s14  ;;  %s356_s19 = scalar_lea.vmem [#allocation6], %s1411_s11 }
  0x19   : > { %s365_s20 = sshll.u32 %s356_s19, 4  ;;  %s1429_s21 = scalar_lea.sflag [#allocation7], %s352_s15  ;;  %s366_s20 = int_to_ptr.vmem [resolvable:$true] %s365_s20 }
  0x1a   : > { %p1717_p8 = pneg %p1416_p7  ;;  %s1070_s22 = scalar_lea.vmem %s366_s20, 128 }
  0x1b   : > { %p1071_p9 = scmp.ne.s32.totalorder %s366_s20, %s1070_s22  ;;  %s1313_s23 = smov [#allocation6]  }
  0x1c   : > { %s1075_s8 = sshll.u32 %s1313_s23, 4  ;;  %s1076_s8 = int_to_ptr.vmem [resolvable:$false] %s1075_s8 }
  0x1d   : > { %s363_s18 = scalar_lea.hbm %s1730_s1, %s1414_s12  ;;  %p1073_p10 = pnand %p1071_p9, %p1717_p8 }
  0x1e   : > { %s1077_s9 = scalar_lea.vmem %s1076_s8, 256  ;;  %p1078_p12 = scmp.lt.s32.totalorder %s366_s20, %s1076_s8 }
  0x1f   : > { %p1074_p11 = pneg %p1073_p10  ;;  %p1079_p13 = scmp.lt.s32.totalorder %s1077_s9, %s1070_s22 }
  0x21   : > { %p1080_p0 = por %p1079_p13, %p1078_p12 }
  0x23   : > { %p1081_p2 = pnand %p1080_p0, %p1074_p11 }
  0x25   : > { %1084 = shalt.err (!%p1081_p2)
}
  0x26   : > { %986 = dma.hbm_to_vmem [thread:$0]  (!%p1416_p7), %s363_s18, 128, %s366_s20, %s1429_s21  }
  0x27   : > { %s1440_s15 = sadd.s32 4294967295, %s1311_s29   ;;  %s1713_s16 = sadd.s32 4294967294, %s1311_s29  }
  0x28   : > { %p81_p4 = scmp.ne.s32.totalorder %s1295_s25, %s1291_s24  ;;  %p1716_p5 = scmp.eq.s32.totalorder %s1440_s15, 0 }
  0x29   : > { %p223_p6 = scmp.eq.s32.totalorder %s1440_s15, 1  ;;  %p229_p9 = scmp.eq.s32.totalorder %s1713_s16, 1 }
  0x2a   : > { %p898_p10 = scmp.ge.s32.totalorder %s1311_s29, 1  ;;  %p1452_p11 = por %p1716_p5, %p81_p4 }
  0x2b   : > { %p1459_p12 = por %p223_p6, %p75_p1  ;;  %p1463_p13 = por %p229_p9, %p81_p4 }
  0x2c   : > { %p296_p0 = scmp.lt.s32.totalorder %s1311_s29, 3  ;;  %s1314_s22 = smov [#allocation9]  }
  0x2d   : > { %s1733_s19 = scalar_select %p1463_p13, 1, 0 }
  0x2e   : > { %p1468_p2 = pnand %p898_p10, %p296_p0  ;;  %s312_s23 = sshll.u32 %s1314_s22, 4  ;;  %s313_s23 = int_to_ptr.vmem [resolvable:$true] %s312_s23 }
  0x2f   : > { %1734 = sst [smem:[#allocation25_spill]] %s1733_s19  ;;  %s336_s1 = scalar_lea.vmem [#allocation3], %s1411_s11 }
  0x30   : > { %p976_p3 = pneg %p1468_p2  ;;  %s345_s30 = sshll.u32 %s336_s1, 4  ;;  %s1485_s30 = int_to_ptr.vmem [resolvable:$true] %s345_s30 }
  0x31   : > { %s1096_s22 = scalar_lea.vmem %s313_s23, 512  ;;  %p1104_p0 = scmp.lt.s32.totalorder %s313_s23, %s313_s23 }
  0x32   : > { %p1476_p1 = pnand %p976_p3, %p1716_p5  ;;  %p1097_p6 = scmp.ne.s32.totalorder %s313_s23, %s1096_s22 }
  0x33   : > { %p1105_p3 = scmp.lt.s32.totalorder %s1096_s22, %s1096_s22 }
  0x34   : > { %p1087_p4 = pneg %p1476_p1 }
  0x35   : > { %p1106_p5 = por %p1105_p3, %p1104_p0 }
  0x36   : > { %p1099_p9 = pnand %p1097_p6, %p1087_p4 }
  0x38   : > { %p1100_p10 = pneg %p1099_p9 }
  0x3a   : > { %p1107_p8 = pnand %p1106_p5, %p1100_p10 }
  0x3c   : > { %1110 = shalt.err (!%p1107_p8)
}
  0x3d   : > { %s1315_s28 = smov 128   ;;  %s1316_s1 = smov 8  }
  0x3e   : > { %979 = dma.hbm_to_vmem [thread:$0]  (!%p1476_p1), %s1708_s3, 512, %s313_s23, [#allocation10], %s1315_s28, %s1315_s28, %s1316_s1  }
  0x3f   : > { %s1737_s10 = sand.u32 1, %s1299_s26   ;;  %s1124_s29 = scalar_lea.vmem %s1485_s30, 128 }
  0x40   : > { %s333_s14 = scalar_lea.sflag [#allocation4], %s1737_s10  ;;  %p1125_p4 = scmp.ne.s32.totalorder %s1485_s30, %s1124_s29 }
  0x41   : > { %p1738_p5 = pneg %p1416_p7  ;;  %s1317_s22 = smov [#allocation3]  }
  0x42   : > { %s1129_s19 = sshll.u32 %s1317_s22, 4  ;;  %s1130_s19 = int_to_ptr.vmem [resolvable:$false] %s1129_s19 }
  0x43   : > { %p1127_p8 = pnand %p1125_p4, %p1738_p5  ;;  %s1131_s24 = scalar_lea.vmem %s1130_s19, 256 }
  0x44   : > { %p1132_p9 = scmp.lt.s32.totalorder %s1485_s30, %s1130_s19  ;;  %p1133_p10 = scmp.lt.s32.totalorder %s1131_s24, %s1124_s29 }
  0x45   : > { %p1128_p6 = pneg %p1127_p8 }
  0x46   : > { %p1134_p0 = por %p1133_p10, %p1132_p9 }
  0x48   : > { %p1135_p3 = pnand %p1134_p0, %p1128_p6 }
  0x4a   : > { %1138 = shalt.err (!%p1135_p3)
}
  0x4b   : > { %s1739_s23 = scalar_lea.hbm %s1705_s0, %s1414_s12  ;;  %s383_s19 = scalar_lea.hbm %s1707_s2, %s1414_s12 }
  0x4c   : > { %983 = dma.hbm_to_vmem [thread:$0]  (!%p1416_p7), %s1739_s23, 128, %s1485_s30, %s333_s14  }
  0x4d   : > { %s376_s24 = scalar_lea.vmem [#allocation8], %s1411_s11  ;;  %p1740_p4 = pmov %p1738_p5 }
  0x4e   : > { %s385_s29 = sshll.u32 %s376_s24, 4  ;;  %s1318_s9 = smov [#allocation8]   ;;  %s386_s29 = int_to_ptr.vmem [resolvable:$true] %s385_s29 }
  0x4f   : > { %s1152_s16 = scalar_lea.vmem %s386_s29, 128  ;;  %s1157_s22 = sshll.u32 %s1318_s9, 4  ;;  %s1158_s22 = int_to_ptr.vmem [resolvable:$false] %s1157_s22 }
  0x50   : > { %p1153_p1 = scmp.ne.s32.totalorder %s386_s29, %s1152_s16  ;;  %s1159_s28 = scalar_lea.vmem %s1158_s22, 256 }
  0x51   : > { %p1160_p6 = scmp.lt.s32.totalorder %s386_s29, %s1158_s22  ;;  %p1161_p9 = scmp.lt.s32.totalorder %s1159_s28, %s1152_s16 }
  0x52   : > { %p1155_p5 = pnand %p1153_p1, %p1740_p4 }
  0x53   : > { %p1162_p10 = por %p1161_p9, %p1160_p6 }
  0x54   : > { %p1156_p8 = pneg %p1155_p5 }
  0x56   : > { %p1163_p0 = pnand %p1162_p10, %p1156_p8 }
  0x58   : > { %1166 = shalt.err (!%p1163_p0)
}
  0x59   : > { %989 = dma.hbm_to_vmem [thread:$0]  (!%p1416_p7), %s383_s19, 128, %s386_s29, %s1429_s21  }
  0x5a   : > { %394 = sbr.rel (%p1468_p2) target bundleno = 379 (0x17b), region = 40  ;;  %s1524_s30 = sand.u32 (!%p1468_p2), 1, %s1295_s25  }
  0x5b   : > { %s1527_s11 = sshll.u32 (!%p1468_p2), %s1524_s30, 3  ;;  %s397_s12 = scalar_lea.sflag (!%p1468_p2), [#allocation4], %s1524_s30 }
  0x5c   : > { %s400_s14 = scalar_lea.vmem (!%p1468_p2), [#allocation3], %s1527_s11 }
  0x5f   : > { %1270 = dma.done.wait (%p1452_p11), %s397_s12, 128  }
  0x60   : > { %1272 = vsyncadd (%p1452_p11), %s397_s12, 4294967168  ;;  %s405_s13 = sand.u32 1, %s1440_s15   ;;  %s409_s20 = scalar_lea.vmem [#allocation6], %s1527_s11 }
  0x61   : > { %s406_s21 = scalar_lea.sflag [#allocation7], %s405_s13 }
  0x62   : > { %1274 = dma.done.wait (%p1452_p11), %s406_s21, 256  }
  0x63   : > { %1276 = vsyncadd (%p1452_p11), %s406_s21, 4294967040  ;;  %s418_s10 = scalar_lea.vmem [#allocation8], %s1527_s11  ;;  %p1741_p7 = scmp.eq.s32.totalorder %s1440_s15, 0 }
  0x65   : > { %1278 = dma.done.wait (%p1741_p7), [#allocation10], 512   ;;  %p1742_p2 = pmov %p1741_p7 }
  0x66   : > { %vm484_vm0 = vcmask 261120   ;;  %v1319_v0 = vmov 0.0   ;;  %vm1320_vm1 = vmmov 0   ;;  %v497_v1 = vld [vmem:[#allocation9 + $0x18] sm:$0xff]  ;;  %v496_v2 = vld [vmem:[#allocation9 + $0x10] sm:$0xff]  ;;  %v495_v3 = vld [vmem:[#allocation9 + $0x8] sm:$0xff] }
  0x67   : > { %1280 = vsyncadd (%p1742_p2), [#allocation10], 4294966784  ;;  %935 = vmatprep.subr.mxu0 %v1319_v0  ;;  %952 = vmatprep.subr.mxu1 %v1319_v0  ;;  %485 = vst.msk [vmem:[#allocation2] sm:$0xff] %vm484_vm0, %v1319_v0  ;;  %v494_v4 = vld [vmem:[#allocation9] sm:$0xff]  ;;  %v488_v5 = vld [vmem:[%s400_s14] sm:$0xff]  ;;  %s1570_s8 = sshll.u32 %s1303_s27, 7 }
  0x68   : > { %486 = vst.msk [vmem:[#allocation2 + $0x8] sm:$0xff] %vm484_vm0, %v1319_v0  ;;  %487 = vst.msk [vmem:[#allocation2 + $0x10] sm:$0xff] %vm484_vm0, %v1319_v0  ;;  %943 = vmatprep.mubr.msk.f32.mxu0 %vm1320_vm1, %v1319_v0  ;;  %946 = vmatprep.mubr.msk.f32.mxu1 %vm1320_vm1, %v1319_v0  ;;  %v489_v6 = vld [vmem:[%s409_s20] sm:$0xff]  ;;  %v490_v7 = vld [vmem:[%s418_s10] sm:$0xff]  ;;  %s468_s1 = scalar_lea.vmem [#allocation12], %s1527_s11  ;;  %s461_s24 = scalar_lea.vmem [#allocation11], %s1527_s11 }
  0x69   : > { %936 = vmatpush3.msra.mxu0 %v497_v1  ;;  %956 = vmatpush3.msra.mxu1 %v497_v1  ;;  %v919_v20 = vld [vmem:[%s1709_s4] ss:$0 sm:$0xff]  ;;  %s655_s19 = sshll.u32 %s468_s1, 4  ;;  %s640_s29 = sshll.u32 %s461_s24, 4  ;;  %s1582_s19 = int_to_ptr.vmem [resolvable:$true] %s655_s19  ;;  %s1596_s29 = int_to_ptr.vmem [resolvable:$true] %s640_s29 }
  0x6a   : > { %937 = vmatprep.subr.mxu0 %v1319_v0  ;;  %953 = vmatprep.subr.mxu1 %v1319_v0  ;;  %s1580_s22 = scalar_lea.hbm %s1711_s6, %s1570_s8  ;;  %s475_s27 = scalar_lea.vmem [#allocation14], %s1527_s11 }
  0x6b   : > { %938 = vmatpush3.msra.mxu0 %v496_v2  ;;  %957 = vmatpush3.msra.mxu1 %v496_v2  ;;  %s1587_s28 = sshll.u32 %s475_s27, 4  ;;  %s1594_s21 = scalar_lea.hbm %s1710_s5, %s1570_s8  ;;  %s1633_s28 = int_to_ptr.vmem [resolvable:$true] %s1587_s28 }
  0x6c   : > { %939 = vmatprep.subr.mxu0 %v1319_v0  ;;  %954 = vmatprep.subr.mxu1 %v1319_v0  ;;  %s1600_s20 = scalar_lea.sflag [#allocation13], %s405_s13  ;;  %s1167_s10 = scalar_lea.vmem %s1582_s19, 128 }
  0x6d   : > { %940 = vmatpush3.msra.mxu0 %v495_v3  ;;  %958 = vmatpush3.msra.mxu1 %v495_v3  ;;  %p1168_p11 = scmp.ne.s32.totalorder %s1582_s19, %s1167_s10  ;;  %s1321_s17 = smov [#allocation12]  }
  0x6e   : > { %941 = vmatprep.subr.mxu0 %v1319_v0  ;;  %955 = vmatprep.subr.mxu1 %v1319_v0  ;;  %v491_v8 = vld [vmem:[#allocation2] sm:$0xff]  ;;  %s1171_s23 = sshll.u32 %s1321_s17, 4  ;;  %s1172_s23 = int_to_ptr.vmem [resolvable:$false] %s1171_s23 }
  0x6f   : > { %942 = vmatpush3.msra.mxu0 %v494_v4  ;;  %959 = vmatpush3.msra.mxu1 %v494_v4  ;;  %v492_v9 = vld [vmem:[#allocation2 + $0x8] sm:$0xff]  ;;  %v493_v16 = vld [vmem:[#allocation2 + $0x10] sm:$0xff]  ;;  %p1169_p3 = pnand %p1168_p11, %p1459_p12  ;;  %p1174_p4 = scmp.lt.s32.totalorder %s1582_s19, %s1172_s23 }
  0x70   : > { %944 = vmatmul.mubr.msk.f32.vlgmr.msra.gmra.mxu0 %vm484_vm0, %v488_v5  ;;  %947 = vmatmul.mubr.msk.f32.vlgmr.msra.gmra.mxu1 %vm484_vm0, %v489_v6 }
  0x71   : > { %949 = vmatprep.mubr.msk.f32.mxu1 %vm1320_vm1, %v1319_v0  ;;  %p1170_p1 = pneg %p1169_p3 }
  0x74   : > { %950 = vmatmul.mubr.msk.f32.gmra.mxu1 %vm484_vm0, %v490_v7 }
 0x130   : > { %v574_v10 = vpop.f32.mrf.mxu0  ;;  %v579_v11 = vpop.f32.mrf.mxu1 }
 0x131   : > { %v588_v12 = vadd.f32 %v574_v10, %v491_v8  ;;  %v589_v13 = vadd.f32 %v579_v11, %v492_v9 }
 0x132   : > { %v945_v14 = vpop.f32.mrf.mxu0  ;;  %v948_v15 = vpop.f32.mrf.mxu1 }
 0x133   : > { %591 = vst.msk [vmem:[#allocation2] sm:$0xff] %vm484_vm0, %v588_v12  ;;  %592 = vst.msk [vmem:[#allocation2 + $0x8] sm:$0xff] %vm484_vm0, %v589_v13 }
 0x134   : > { %v584_v17 = vpop.f32.mrf.mxu1 }
 0x135   : > { %v590_v18 = vadd.f32 %v584_v17, %v493_v16 }
 0x136   : > { %v951_v19 = vpop.f32.mrf.mxu1 }
 0x137   : > { %593 = vst.msk [vmem:[#allocation2 + $0x10] sm:$0xff] %vm484_vm0, %v590_v18 }
 0x13a   : > { %v608_v21 = vld [vmem:[#allocation2 + $0x8] sm:$0xff]  ;;  %v598_v22 = vld [vmem:[#allocation2] sm:$0xff] }
 0x13b   : > { %v609_v23 = vadd.f32 %v919_v20, %v608_v21  ;;  %v605_v24 = vadd.f32 %v919_v20, %v598_v22 }
 0x13d   : > { %610 = vst.msk [vmem:[%s468_s1] sm:$0xff] %vm484_vm0, %v609_v23  ;;  %v606_v25 = vmul.f32 0.17677669, %v605_v24  ;;  %s1173_s1 = scalar_lea.vmem %s1172_s23, 256 }
 0x13e   : > { %p1175_p5 = scmp.lt.s32.totalorder %s1173_s1, %s1167_s10 }
 0x140   : > { %p1176_p8 = por %p1175_p5, %p1174_p4 }
 0x142   : > { %p1177_p6 = pnand %p1176_p8, %p1170_p1 }
 0x144   : > { %1180 = shalt.err (!%p1177_p6)
}
 0x145   : > { %s1181_s15 = scalar_lea.hbm %s1580_s22, 128  ;;  %s1185_s9 = scalar_lea.hbm %s1711_s6, 256 }
 0x146   : > { %p1182_p9 = scmp.ne.s32.totalorder %s1580_s22, %s1181_s15  ;;  %p1186_p7 = scmp.lt.s32.totalorder %s1580_s22, %s1711_s6 }
 0x147   : > { %p1187_p2 = scmp.lt.s32.totalorder %s1185_s9, %s1181_s15 }
 0x148   : > { %p1183_p10 = pnand %p1182_p9, %p1459_p12 }
 0x149   : > { %p1188_p11 = por %p1187_p2, %p1186_p7 }
 0x14a   : > { %p1184_p0 = pneg %p1183_p10 }
 0x14c   : > { %p1189_p3 = pnand %p1188_p11, %p1184_p0 }
 0x14e   : > { %1192 = shalt.err (!%p1189_p3)
}
 0x14f   : > { %971 = dma.vmem_to_hbm [thread:$0]  (%p1459_p12), %s1582_s19, 128, %s1580_s22, %s1600_s20   ;;  %v611_v26 = vld [vmem:[#allocation2 + $0x10] sm:$0xff]  ;;  %607 = vst.msk [vmem:[%s461_s24] sm:$0xff] %vm484_vm0, %v606_v25 }
 0x150   : > { %v612_v27 = vadd.f32 %v919_v20, %v611_v26  ;;  %s1630_s23 = scalar_lea.hbm %s1712_s7, %s1570_s8  ;;  %s615_s1 = scalar_lea.sflag [#allocation5], %s1524_s30 }
 0x151   : > { %s1193_s15 = scalar_lea.vmem %s1596_s29, 128  ;;  %s1322_s13 = smov [#allocation11]  }
 0x152   : > { %p1194_p1 = scmp.ne.s32.totalorder %s1596_s29, %s1193_s15  ;;  %s1197_s19 = sshll.u32 %s1322_s13, 4  ;;  %s1198_s19 = int_to_ptr.vmem [resolvable:$false] %s1197_s19 }
 0x153   : > { %s1199_s22 = scalar_lea.vmem %s1198_s19, 256  ;;  %p1200_p8 = scmp.lt.s32.totalorder %s1596_s29, %s1198_s19 }
 0x154   : > { %p1195_p4 = pnand %p1194_p1, %p1459_p12  ;;  %p1201_p6 = scmp.lt.s32.totalorder %s1199_s22, %s1193_s15 }
 0x156   : > { %p1196_p5 = pneg %p1195_p4  ;;  %p1202_p9 = por %p1201_p6, %p1200_p8 }
 0x158   : > { %p1203_p10 = pnand %p1202_p9, %p1196_p5 }
 0x15a   : > { %1206 = shalt.err (!%p1203_p10)
}
 0x15b   : > { %s1207_s8 = scalar_lea.hbm %s1594_s21, 128  ;;  %s1211_s16 = scalar_lea.hbm %s1710_s5, 256 }
 0x15c   : > { %p1208_p0 = scmp.ne.s32.totalorder %s1594_s21, %s1207_s8  ;;  %p1212_p11 = scmp.lt.s32.totalorder %s1594_s21, %s1710_s5 }
 0x15d   : > { %p1213_p3 = scmp.lt.s32.totalorder %s1211_s16, %s1207_s8 }
 0x15e   : > { %p1209_p7 = pnand %p1208_p0, %p1459_p12 }
 0x15f   : > { %p1214_p1 = por %p1213_p3, %p1212_p11 }
 0x160   : > { %p1210_p2 = pneg %p1209_p7 }
 0x162   : > { %p1215_p4 = pnand %p1214_p1, %p1210_p2 }
 0x164   : > { %1218 = shalt.err (!%p1215_p4)
}
 0x165   : > { %970 = dma.vmem_to_hbm [thread:$0]  (%p1459_p12), %s1596_s29, 128, %s1594_s21, %s615_s1   ;;  %613 = vst.msk [vmem:[%s475_s27] sm:$0xff] %vm484_vm0, %v612_v27 }
 0x166   : > { %s1219_s14 = scalar_lea.vmem %s1633_s28, 128  ;;  %s1323_s10 = smov [#allocation14]  }
 0x167   : > { %p1220_p5 = scmp.ne.s32.totalorder %s1633_s28, %s1219_s14  ;;  %s1223_s17 = sshll.u32 %s1323_s10, 4  ;;  %s1224_s17 = int_to_ptr.vmem [resolvable:$false] %s1223_s17 }
 0x168   : > { %s1225_s15 = scalar_lea.vmem %s1224_s17, 256  ;;  %p1226_p9 = scmp.lt.s32.totalorder %s1633_s28, %s1224_s17 }
 0x169   : > { %p1221_p8 = pnand %p1220_p5, %p1459_p12  ;;  %p1227_p10 = scmp.lt.s32.totalorder %s1225_s15, %s1219_s14 }
 0x16b   : > { %p1222_p6 = pneg %p1221_p8  ;;  %p1228_p0 = por %p1227_p10, %p1226_p9 }
 0x16d   : > { %p1229_p7 = pnand %p1228_p0, %p1222_p6 }
 0x16f   : > { %1232 = shalt.err (!%p1229_p7)
}
 0x170   : > { %s1233_s11 = scalar_lea.hbm %s1630_s23, 128  ;;  %s1237_s21 = scalar_lea.hbm %s1712_s7, 256 }
 0x171   : > { %p1234_p2 = scmp.ne.s32.totalorder %s1630_s23, %s1233_s11  ;;  %p1238_p1 = scmp.lt.s32.totalorder %s1630_s23, %s1712_s7 }
 0x172   : > { %p1239_p4 = scmp.lt.s32.totalorder %s1237_s21, %s1233_s11 }
 0x173   : > { %p1235_p11 = pnand %p1234_p2, %p1459_p12 }
 0x174   : > { %p1240_p5 = por %p1239_p4, %p1238_p1 }
 0x175   : > { %p1236_p3 = pneg %p1235_p11 }
 0x177   : > { %p1241_p8 = pnand %p1240_p5, %p1236_p3 }
 0x179   : > { %1244 = shalt.err (!%p1241_p8)
}
 0x17a   : > { %972 = dma.vmem_to_hbm [thread:$0]  (%p1459_p12), %s1633_s28, 128, %s1630_s23, %s1600_s20  }
 0x17b PF: > { %s1743_s19 = sld [smem:[#allocation20_spill]] }
 0x17c   : > { %s1745_s8 = sld [smem:[#allocation22_spill]] }
 0x181   : > { %s682_s30 = sand.u32 1, %s1743_s19  }
 0x182   : > { %p1746_p6 = scmp.ge.s32.totalorder %s1745_s8, 2  ;;  %s683_s24 = scalar_lea.sflag [#allocation5], %s682_s30 }
 0x184   : > { %p991_p9 = pnand %p1746_p6, %p1463_p13 }
 0x186   : > { %p992_p10 = pneg %p991_p9 }
 0x188   : > { %1282 = dma.done.wait (%p992_p10), %s683_s24, 128  }
 0x189   : > { %1284 = vsyncadd (%p992_p10), %s683_s24, 4294967168  ;;  %s1747_s16 = sadd.s32 4294967294, %s1745_s8  }
 0x18a   : > { %s691_s9 = sand.u32 1, %s1747_s16  }
 0x18b   : > { %s692_s18 = scalar_lea.sflag [#allocation13], %s691_s9 }
 0x18c   : > { %1286 = dma.done.wait (%p992_p10), %s692_s18, 256  }
 0x18d   : > { %1288 = vsyncadd (%p992_p10), %s692_s18, 4294967040  ;;  %s31_s29 = sadd.s32 1, %s1745_s8   ;;  %s1748_s28 = sld [smem:[#allocation24_spill]] }
 0x18e   : > { %p28_p12 = scmp.ge.s32.totalorder %s31_s29, 4   ;;  %s1749_s27 = sld [smem:[#allocation21_spill]] }
 0x18f   : > { %s1750_s20 = sld [smem:[#allocation23_spill]]  ;;  %s1751_s24 = smov %s1295_s25 }
 0x190   : > { %s1752_s25 = smov %s1299_s26 }
 0x191   :  { %30 = sbr.rel (!%p28_p12) target bundleno = 13 (0xd), region = 157 }
 0x193   : > { %s1753_s26 = smov %s1748_s28 }
 0x195   : > { %s1754_s28 = smov %s1750_s20 }
 0x196   :  { %706 = vsyncpa [#allocation4], 1 }
 0x197   :  { %708 = vsyncpa [#allocation4 + $0x1], 1 }
 0x198   :  { %709 = vsyncpa [#allocation7], 1 }
 0x199   :  { %711 = vsyncpa [#allocation7 + $0x1], 1 }
 0x19a   :  { %712 = vsyncpa [#allocation10], 1 }
 0x19b   :  { %713 = vsyncpa [#allocation5], 1 }
 0x19c   :  { %715 = vsyncpa [#allocation5 + $0x1], 1 }
 0x19d   :  { %716 = vsyncpa [#allocation13], 1 }
 0x19e   :  { %718 = vsyncpa [#allocation13 + $0x1], 1 }

</bundles_post_ra>
